<compile_context>
chip_gen: v7x
topology: tpu7x:2x2x1
jax: 0.10.0
libtpu: 0.0.40
codegen_flags: <defaults>
</compile_context>

<pallas_src>
import jax
import jax.numpy as jnp
import numpy as np
from jax.experimental import pallas as pl
from jax.experimental.pallas import tpu as pltpu

_LANES = 128      # vreg lane width
_SUBLANES = 8     # f32 vreg sublane count
# Padding logit: sigmoid(-40) ~ 4e-18 and bce(-40, target=0) ~ 4e-18, so padded
# elements contribute essentially nothing to any of the accumulated sums.
_PRED_PAD = -40.0


def _round_up(x, mult):
    return ((x + mult - 1) // mult) * mult


def _dice_ce_kernel(pred_ref, target_ref, out_ref):
    """Accumulate per-row partial sums (inter, sum_p, sum_t, bce) into the
    resident (4, 8, 128) output block; cross-lane reduction is deferred."""
    k = pl.program_id(2)

    @pl.when(k == 0)
    def _():
        out_ref[...] = jnp.zeros_like(out_ref)

    x = pred_ref[...].astype(jnp.float32)     # logits tile, (sub, 128)
    t = target_ref[...].astype(jnp.float32)   # targets tile, (sub, 128)

    # One shared exp for both the sigmoid and the stable BCE term.
    z = jnp.exp(-jnp.abs(x))                              # EUP exp
    p = jnp.where(x >= 0.0, 1.0, z) / (1.0 + z)           # exact, stable sigmoid
    # PyTorch BCEWithLogits (stable): max(x,0) - x*t + log1p(exp(-|x|))
    bce = jnp.maximum(x, 0.0) - x * t + jnp.log1p(z)      # EUP log1p

    sub = x.shape[0]

    def fold(v):  # (sub, 128) -> (8, 128) via pure vreg (VPU) adds, no XLU
        return jnp.sum(v.reshape(sub // _SUBLANES, _SUBLANES, _LANES), axis=0)

    out_ref[0] += fold(p * t)   # intersection
    out_ref[1] += fold(p)       # sum(sigmoid(pred))
    out_ref[2] += fold(t)       # sum(target)
    out_ref[3] += fold(bce)     # BCE-with-logits row sum


def dice_and_ce_loss_binary(pred, target, smooth=1.0, weight_ce=1.0,
                            weight_dice=1.0, block_sublanes=2048, num_splits=2):
    """pred/target: [N, ...] logits / binary targets (any trailing shape, any dtype).
    Returns the scalar combined loss (f32), matching the PyTorch module."""
    n = pred.shape[0]
    pred_flat = pred.reshape(n, -1)
    target_flat = target.reshape(n, -1)
    m = pred_flat.shape[1]

    # --- choose a dense (sub, 128) tiling along the flattened axis ---
    r = -(-m // _LANES)                               # rows of 128 lanes
    sub = min(block_sublanes, _round_up(r, 32))       # mult of 32: safe for i8/bf16 packing
    sub = _round_up(sub, 32)
    kb_total = -(-r // sub)                           # reduction blocks (pre-split)
    # Extra parallel axis keeps both v7x TensorCores busy even for tiny N;
    # only enable it when it does not create excessive padding.
    if kb_total % num_splits == 0 or kb_total >= 4 * num_splits:
        splits = num_splits
    else:
        splits = 1
    kb = -(-kb_total // splits)                       # reduction blocks per split
    r_pad = splits * kb * sub
    m_pad = r_pad * _LANES

    if m_pad != m:
        pad = m_pad - m
        pred_flat = jnp.pad(pred_flat, ((0, 0), (0, pad)),
                            constant_values=_PRED_PAD)
        target_flat = jnp.pad(target_flat, ((0, 0), (0, pad)),
                              constant_values=0)

    pred3 = pred_flat.reshape(n, r_pad, _LANES)
    target3 = target_flat.reshape(n, r_pad, _LANES)

    in_bytes = m_pad * (pred3.dtype.itemsize + target3.dtype.itemsize)
    partials = pl.pallas_call(
        _dice_ce_kernel,
        out_shape=jax.ShapeDtypeStruct((n, splits, 4, _SUBLANES, _LANES),
                                       jnp.float32),
        grid_spec=pltpu.PrefetchScalarGridSpec(
            num_scalar_prefetch=0,
            grid=(n, splits, kb),
            in_specs=[
                pl.BlockSpec((None, sub, _LANES),
                             lambda i, h, k: (i, h * kb + k, 0)),
                pl.BlockSpec((None, sub, _LANES),
                             lambda i, h, k: (i, h * kb + k, 0)),
            ],
            out_specs=pl.BlockSpec((None, None, 4, _SUBLANES, _LANES),
                                   lambda i, h, k: (i, h, 0, 0, 0)),
        ),
        compiler_params=pltpu.CompilerParams(
            dimension_semantics=("parallel", "parallel", "arbitrary"),
            vmem_limit_bytes=32 * 1024 * 1024,
        ),
        cost_estimate=pl.CostEstimate(
            flops=10 * n * m_pad,
            transcendentals=2 * n * m_pad,
            bytes_accessed=n * in_bytes
            + n * splits * 4 * _SUBLANES * _LANES * 4,
        ),
    )(pred3, target3)

    # --- tiny scalar epilogue in JAX (negligible work) ---
    sums = jnp.sum(partials, axis=(1, 3, 4))          # (n, 4)
    inter, sum_p, sum_t, ce_row = (sums[:, 0], sums[:, 1], sums[:, 2], sums[:, 3])
    dice = 1.0 - (2.0 * inter + smooth) / (sum_p + sum_t + smooth)
    ce_total = jnp.sum(ce_row) / m                    # (BCE elementwise / M).sum()
    return (weight_ce * ce_total + weight_dice * jnp.sum(dice)) / (2.0 * n)


def _reference_loss(pred, target, smooth=1.0, weight_ce=1.0, weight_dice=1.0):
    """Pure-JAX reference mirroring the PyTorch module."""
    n = pred.shape[0]
    x = pred.reshape(n, -1).astype(jnp.float32)
    t = target.reshape(n, -1).astype(jnp.float32)
    m = x.shape[1]
    p = jax.nn.sigmoid(x)
    inter = (p * t).sum(1)
    union = p.sum(1) + t.sum(1)
    dice = 1.0 - (2.0 * inter + smooth) / (union + smooth)
    bce = jnp.maximum(x, 0.0) - x * t + jnp.log1p(jnp.exp(-jnp.abs(x)))
    ce = (bce / m).sum()
    return (weight_ce * ce + weight_dice * dice.sum()) / (2.0 * n)


if __name__ == "__main__":
    key = jax.random.PRNGKey(0)
    k1, k2 = jax.random.split(key)

    N, C, H, W = 2, 4, 16, 16
    pred = jax.random.normal(k1, (N, C, H, W), dtype=jnp.float32)              # logits
    target = (jax.random.uniform(k2, (N, C, H, W)) > 0.5).astype(jnp.float32)  # binary mask

    loss = jax.block_until_ready(dice_and_ce_loss_binary(pred, target))
    ref = jax.block_until_ready(_reference_loss(pred, target))
    assert np.allclose(np.asarray(loss), np.asarray(ref), rtol=2e-5, atol=2e-5), (loss, ref)

    print("KERNEL_OK")
</pallas_src>

<mosaic_0001>
module attributes {stable_mosaic.version = 11 : i64} {
  func.func @_dice_ce_kernel(%arg0: i32, %arg1: i32, %arg2: i32, %arg3: memref<1x32x128xf32, #tpu.memory_space<vmem>>, %arg4: memref<1x32x128xf32, #tpu.memory_space<vmem>>, %arg5: memref<1x1x4x8x128xf32, #tpu.memory_space<vmem>>) attributes {dimension_semantics = [#tpu.dimension_semantics<parallel>, #tpu.dimension_semantics<parallel>, #tpu.dimension_semantics<arbitrary>], iteration_bounds = array<i64: 2, 1, 1>, scalar_prefetch = 0 : i64, scratch_operands = 0 : i64, tpu.core_type = #tpu.core_type<tc>, window_params = [{transform_indices = @transform_0, window_bounds = array<i64: 1, 32, 128>}, {transform_indices = @transform_1, window_bounds = array<i64: 1, 32, 128>}, {transform_indices = @transform_2, window_bounds = array<i64: 1, 1, 4, 8, 128>}]} {
    %c0_i32 = arith.constant 0 : i32
    %0 = arith.cmpi eq, %arg2, %c0_i32 : i32
    %1 = arith.extui %0 : i1 to i32
    %c0_i32_0 = arith.constant 0 : i32
    %2 = arith.cmpi ne, %1, %c0_i32_0 : i32
    scf.if %2 {
      %cst_51 = arith.constant 0.000000e+00 : f32
      %57 = vector.broadcast %cst_51 : f32 to vector<4x8x128xf32>
      %c0_52 = arith.constant 0 : index
      %c0_53 = arith.constant 0 : index
      %c0_54 = arith.constant 0 : index
      %c0_55 = arith.constant 0 : index
      %c0_56 = arith.constant 0 : index
      %58 = vector.load %arg5[%c0_52, %c0_53, %c0_54, %c0_55, %c0_56] : memref<1x1x4x8x128xf32, #tpu.memory_space<vmem>>, vector<1x1x4x8x128xf32>
      %59 = vector.shape_cast %58 : vector<1x1x4x8x128xf32> to vector<4x8x128xf32>
      %60 = vector.shape_cast %57 : vector<4x8x128xf32> to vector<1x1x4x8x128xf32>
      tpu.vector_store %arg5[%c0_52, %c0_53, %c0_54, %c0_55, %c0_56], %60 {strides = array<i32>} : memref<1x1x4x8x128xf32, #tpu.memory_space<vmem>>, vector<1x1x4x8x128xf32>,
    } else {
    }
    %c0 = arith.constant 0 : index
    %c0_1 = arith.constant 0 : index
    %c0_2 = arith.constant 0 : index
    %3 = vector.load %arg3[%c0, %c0_1, %c0_2] : memref<1x32x128xf32, #tpu.memory_space<vmem>>, vector<1x32x128xf32>
    %4 = vector.shape_cast %3 : vector<1x32x128xf32> to vector<32x128xf32>
    %c0_3 = arith.constant 0 : index
    %c0_4 = arith.constant 0 : index
    %c0_5 = arith.constant 0 : index
    %5 = vector.load %arg4[%c0_3, %c0_4, %c0_5] : memref<1x32x128xf32, #tpu.memory_space<vmem>>, vector<1x32x128xf32>
    %6 = vector.shape_cast %5 : vector<1x32x128xf32> to vector<32x128xf32>
    %7 = math.absf %4 : vector<32x128xf32>
    %cst = arith.constant 0.000000e+00 : f32
    %8 = vector.broadcast %cst : f32 to vector<32x128xf32>
    %9 = arith.subf %8, %7 : vector<32x128xf32>
    %10 = math.exp %9 : vector<32x128xf32>
    %cst_6 = arith.constant 0.000000e+00 : f32
    %11 = vector.broadcast %cst_6 : f32 to vector<32x128xf32>
    %12 = arith.cmpf oge, %4, %11 : vector<32x128xf32>
    %cst_7 = arith.constant 1.000000e+00 : f32
    %13 = vector.broadcast %cst_7 : f32 to vector<32x128xf32>
    %14 = arith.select %12, %13, %10 : vector<32x128xi1>, vector<32x128xf32>
    %cst_8 = arith.constant 1.000000e+00 : f32
    %15 = vector.broadcast %cst_8 : f32 to vector<32x128xf32>
    %16 = arith.addf %15, %10 : vector<32x128xf32>
    %17 = arith.divf %14, %16 : vector<32x128xf32>
    %cst_9 = arith.constant 0.000000e+00 : f32
    %18 = vector.broadcast %cst_9 : f32 to vector<32x128xf32>
    %19 = arith.maximumf %4, %18 : vector<32x128xf32>
    %20 = arith.mulf %4, %6 : vector<32x128xf32>
    %21 = arith.subf %19, %20 : vector<32x128xf32>
    %22 = math.log1p %10 : vector<32x128xf32>
    %23 = arith.addf %21, %22 : vector<32x128xf32>
    %c0_10 = arith.constant 0 : index
    %c0_11 = arith.constant 0 : index
    %c0_12 = arith.constant 0 : index
    %c0_13 = arith.constant 0 : index
    %c0_14 = arith.constant 0 : index
    %24 = vector.load %arg5[%c0_10, %c0_11, %c0_12, %c0_13, %c0_14] : memref<1x1x4x8x128xf32, #tpu.memory_space<vmem>>, vector<1x1x1x8x128xf32>
    %25 = vector.shape_cast %24 : vector<1x1x1x8x128xf32> to vector<8x128xf32>
    %26 = arith.mulf %17, %6 : vector<32x128xf32>
    %27 = vector.shape_cast %26 : vector<32x128xf32> to vector<4x8x128xf32>
    %cst_15 = arith.constant dense<0.000000e+00> : vector<8x128xf32>
    %28 = vector.multi_reduction <add>, %27, %cst_15 [0] : vector<4x8x128xf32> to vector<8x128xf32>
    %29 = arith.addf %25, %28 : vector<8x128xf32>
    %c0_16 = arith.constant 0 : index
    %c0_17 = arith.constant 0 : index
    %c0_18 = arith.constant 0 : index
    %c0_19 = arith.constant 0 : index
    %c0_20 = arith.constant 0 : index
    %30 = vector.load %arg5[%c0_16, %c0_17, %c0_18, %c0_19, %c0_20] : memref<1x1x4x8x128xf32, #tpu.memory_space<vmem>>, vector<1x1x1x8x128xf32>
    %31 = vector.shape_cast %30 : vector<1x1x1x8x128xf32> to vector<8x128xf32>
    %32 = vector.shape_cast %29 : vector<8x128xf32> to vector<1x1x1x8x128xf32>
    tpu.vector_store %arg5[%c0_16, %c0_17, %c0_18, %c0_19, %c0_20], %32 {strides = array<i32>} : memref<1x1x4x8x128xf32, #tpu.memory_space<vmem>>, vector<1x1x1x8x128xf32>,
    %c0_21 = arith.constant 0 : index
    %c0_22 = arith.constant 0 : index
    %c1 = arith.constant 1 : index
    %c0_23 = arith.constant 0 : index
    %c0_24 = arith.constant 0 : index
    %33 = vector.load %arg5[%c0_21, %c0_22, %c1, %c0_23, %c0_24] : memref<1x1x4x8x128xf32, #tpu.memory_space<vmem>>, vector<1x1x1x8x128xf32>
    %34 = vector.shape_cast %33 : vector<1x1x1x8x128xf32> to vector<8x128xf32>
    %35 = vector.shape_cast %17 : vector<32x128xf32> to vector<4x8x128xf32>
    %cst_25 = arith.constant dense<0.000000e+00> : vector<8x128xf32>
    %36 = vector.multi_reduction <add>, %35, %cst_25 [0] : vector<4x8x128xf32> to vector<8x128xf32>
    %37 = arith.addf %34, %36 : vector<8x128xf32>
    %c0_26 = arith.constant 0 : index
    %c0_27 = arith.constant 0 : index
    %c1_28 = arith.constant 1 : index
    %c0_29 = arith.constant 0 : index
    %c0_30 = arith.constant 0 : index
    %38 = vector.load %arg5[%c0_26, %c0_27, %c1_28, %c0_29, %c0_30] : memref<1x1x4x8x128xf32, #tpu.memory_space<vmem>>, vector<1x1x1x8x128xf32>
    %39 = vector.shape_cast %38 : vector<1x1x1x8x128xf32> to vector<8x128xf32>
    %40 = vector.shape_cast %37 : vector<8x128xf32> to vector<1x1x1x8x128xf32>
    tpu.vector_store %arg5[%c0_26, %c0_27, %c1_28, %c0_29, %c0_30], %40 {strides = array<i32>} : memref<1x1x4x8x128xf32, #tpu.memory_space<vmem>>, vector<1x1x1x8x128xf32>,
    %c0_31 = arith.constant 0 : index
    %c0_32 = arith.constant 0 : index
    %c2 = arith.constant 2 : index
    %c0_33 = arith.constant 0 : index
    %c0_34 = arith.constant 0 : index
    %41 = vector.load %arg5[%c0_31, %c0_32, %c2, %c0_33, %c0_34] : memref<1x1x4x8x128xf32, #tpu.memory_space<vmem>>, vector<1x1x1x8x128xf32>
    %42 = vector.shape_cast %41 : vector<1x1x1x8x128xf32> to vector<8x128xf32>
    %43 = vector.shape_cast %6 : vector<32x128xf32> to vector<4x8x128xf32>
    %cst_35 = arith.constant dense<0.000000e+00> : vector<8x128xf32>
    %44 = vector.multi_reduction <add>, %43, %cst_35 [0] : vector<4x8x128xf32> to vector<8x128xf32>
    %45 = arith.addf %42, %44 : vector<8x128xf32>
    %c0_36 = arith.constant 0 : index
    %c0_37 = arith.constant 0 : index
    %c2_38 = arith.constant 2 : index
    %c0_39 = arith.constant 0 : index
    %c0_40 = arith.constant 0 : index
    %46 = vector.load %arg5[%c0_36, %c0_37, %c2_38, %c0_39, %c0_40] : memref<1x1x4x8x128xf32, #tpu.memory_space<vmem>>, vector<1x1x1x8x128xf32>
    %47 = vector.shape_cast %46 : vector<1x1x1x8x128xf32> to vector<8x128xf32>
    %48 = vector.shape_cast %45 : vector<8x128xf32> to vector<1x1x1x8x128xf32>
    tpu.vector_store %arg5[%c0_36, %c0_37, %c2_38, %c0_39, %c0_40], %48 {strides = array<i32>} : memref<1x1x4x8x128xf32, #tpu.memory_space<vmem>>, vector<1x1x1x8x128xf32>,
    %c0_41 = arith.constant 0 : index
    %c0_42 = arith.constant 0 : index
    %c3 = arith.constant 3 : index
    %c0_43 = arith.constant 0 : index
    %c0_44 = arith.constant 0 : index
    %49 = vector.load %arg5[%c0_41, %c0_42, %c3, %c0_43, %c0_44] : memref<1x1x4x8x128xf32, #tpu.memory_space<vmem>>, vector<1x1x1x8x128xf32>
    %50 = vector.shape_cast %49 : vector<1x1x1x8x128xf32> to vector<8x128xf32>
    %51 = vector.shape_cast %23 : vector<32x128xf32> to vector<4x8x128xf32>
    %cst_45 = arith.constant dense<0.000000e+00> : vector<8x128xf32>
    %52 = vector.multi_reduction <add>, %51, %cst_45 [0] : vector<4x8x128xf32> to vector<8x128xf32>
    %53 = arith.addf %50, %52 : vector<8x128xf32>
    %c0_46 = arith.constant 0 : index
    %c0_47 = arith.constant 0 : index
    %c3_48 = arith.constant 3 : index
    %c0_49 = arith.constant 0 : index
    %c0_50 = arith.constant 0 : index
    %54 = vector.load %arg5[%c0_46, %c0_47, %c3_48, %c0_49, %c0_50] : memref<1x1x4x8x128xf32, #tpu.memory_space<vmem>>, vector<1x1x1x8x128xf32>
    %55 = vector.shape_cast %54 : vector<1x1x1x8x128xf32> to vector<8x128xf32>
    %56 = vector.shape_cast %53 : vector<8x128xf32> to vector<1x1x1x8x128xf32>
    tpu.vector_store %arg5[%c0_46, %c0_47, %c3_48, %c0_49, %c0_50], %56 {strides = array<i32>} : memref<1x1x4x8x128xf32, #tpu.memory_space<vmem>>, vector<1x1x1x8x128xf32>,
    return
  }
  func.func @transform_0(%arg0: i32, %arg1: i32, %arg2: i32) -> (i32, i32, i32) {
    %c1_i32 = arith.constant 1 : i32
    %0 = arith.muli %arg1, %c1_i32 : i32
    %1 = arith.addi %0, %arg2 : i32
    %c0_i32 = arith.constant 0 : i32
    %c0_i32_0 = arith.constant 0 : i32
    return %arg0, %1, %c0_i32 : i32, i32, i32
  }
  func.func @transform_1(%arg0: i32, %arg1: i32, %arg2: i32) -> (i32, i32, i32) {
    %c1_i32 = arith.constant 1 : i32
    %0 = arith.muli %arg1, %c1_i32 : i32
    %1 = arith.addi %0, %arg2 : i32
    %c0_i32 = arith.constant 0 : i32
    %c0_i32_0 = arith.constant 0 : i32
    return %arg0, %1, %c0_i32 : i32, i32, i32
  }
  func.func @transform_2(%arg0: i32, %arg1: i32, %arg2: i32) -> (i32, i32, i32, i32, i32) {
    %c0_i32 = arith.constant 0 : i32
    %c0_i32_0 = arith.constant 0 : i32
    %c0_i32_1 = arith.constant 0 : i32
    %c0_i32_2 = arith.constant 0 : i32
    return %arg0, %arg1, %c0_i32, %c0_i32_0, %c0_i32_1 : i32, i32, i32, i32, i32
  }
}

</mosaic_0001>

<bundles_post_ra>
// kernel: tpu_custom_call.1
= control target key start
LH: loop header
LB: loop body
LE: loop exit
PB: predicated region body
PF: predicated region fallthrough
CT: control target
= control target key end

     0   :  { %7 = vsyncpa [#allocation3], 0  ;;  %s1136_s0 = inlined_call_operand.hbm [shape: f32[2,32,128], index: 0, kind: input, shape index: {}]   ;;  %s1137_s1 = inlined_call_operand.hbm [shape: f32[2,32,128], index: 1, kind: input, shape index: {}]   ;;  %s1138_s2 = inlined_call_operand.hbm [shape: f32[2,1,4,8,128], index: 2, kind: output, shape index: {}]  }
   0x1   :  { %9 = vsyncpa [#allocation3 + $0x1], 0 }
   0x2   :  { %10 = vsyncpa [#allocation6], 0 }
   0x3   :  { %12 = vsyncpa [#allocation6 + $0x1], 0 }
   0x4   :  { %13 = vsyncpa [#allocation4], 0 }
   0x5   :  { %15 = vsyncpa [#allocation4 + $0x1], 0  ;;  %s804_s9 = smov 0   ;;  %s806_s10 = smov 0  }
   0x6   :  { %s808_s11 = smov 0   ;;  %s810_s12 = smov 0  }
   0x7   :  { %s812_s13 = smov 0   ;;  %s814_s14 = smov 0  }
   0x8 LB: > { %s510_s15 = sadd.s32 4294967295, %s780_s14   ;;  %s511_s16 = sadd.s32 4294967294, %s780_s14   ;;  %s780_s14 = sphi %s814_s14, %s21_s14   ;;  %s776_s13 = sphi %s812_s13, %s1162_s13   ;;  %s772_s12 = sphi %s810_s12, %s1161_s12   ;;  %s768_s11 = sphi %s808_s11, %s1160_s11   ;;  %s764_s10 = sphi %s806_s10, %s1159_s10   ;;  %s760_s9 = sphi %s804_s9, %s1158_s9  }
   0x9   : > { %s40_s17 = sadd.s32 1, %s776_s13  ;;  %s51_s18 = sadd.s32 1, %s768_s11 }
   0xa   : > { %p42_p0 = scmp.ge.s32.totalorder %s40_s17, 2  ;;  %p58_p1 = scmp.ne.s32.totalorder %s768_s11, %s764_s10 }
   0xb   : > { %p59_p2 = scmp.eq.s32.totalorder %s780_s14, 0  ;;  %p64_p3 = scmp.ne.s32.totalorder %s764_s10, %s760_s9 }
   0xc   : > { %s1164_s17 = smov (%p42_p0, %s40_s17), 0  ;;  %p65_p5 = scmp.eq.s32.totalorder %s510_s15, 0 }
   0xd   : > { %p845_p4 = por %p59_p2, %p58_p1  ;;  %s46_s20 = ssub.s32 %s776_s13, %s1164_s17 }
   0xe   : > { %p120_p6 = scmp.eq.s32.totalorder %s510_s15, 1  ;;  %p49_p7 = scmp.eq.s32.totalorder %s46_s20, 0 }
   0xf   : > { %p851_p8 = por %p65_p5, %p64_p3  ;;  %p126_p10 = scmp.eq.s32.totalorder %s511_s16, 1 }
  0x10   : > { %p855_p9 = por %p120_p6, %p58_p1  ;;  %p555_p13 = scmp.lt.s32.totalorder %s780_s14, 2 }
  0x11   : > { %s1142_s21 = scalar_select %p851_p8, 1, 0 }
  0x12   : > { %s1143_s22 = scalar_select %p855_p9, 1, 0 }
  0x13   : > { %s860_s23 = scalar_select %p49_p7, %s768_s11, %s51_s18  }
  0x14   : > { %p862_p11 = por %p126_p10, %p64_p3  ;;  %s869_s25 = sand.u32 1, %s768_s11  }
  0x15   : > { %s514_s26 = sshll.u32 %s869_s25, 5  ;;  %s535_s27 = sshll.u32 %s776_s13, 9 }
  0x16   : > { %s1144_s24 = scalar_select %p862_p11, 1, 0 }
  0x17   : > { %s878_s30 = scalar_lea.hbm %s1136_s0, %s535_s27  ;;  %s150_s3 = scalar_lea.vmem [#allocation2], %s514_s26 }
  0x18   : > { %s160_s4 = sshll.u32 %s150_s3, 4  ;;  %p886_p0 = pnand %p555_p13, %p845_p4  ;;  %s882_s4 = int_to_ptr.vmem [resolvable:$true] %s160_s4 }
  0x19   : > { %s147_s6 = scalar_lea.sflag [#allocation3], %s869_s25  ;;  %s634_s7 = scalar_lea.hbm %s878_s30, 512 }
  0x1a   : > { %p635_p2 = scmp.ne.s32.totalorder %s878_s30, %s634_s7  ;;  %p636_p3 = pneg %p886_p0 }
  0x1b   : > { %s639_s16 = scalar_lea.hbm %s1136_s0, 1024  ;;  %p640_p4 = scmp.lt.u32.totalorder %s878_s30, %s1136_s0 }
  0x1c   : > { %p637_p5 = pnand %p636_p3, %p635_p2  ;;  %p641_p7 = scmp.lt.u32.totalorder %s639_s16, %s634_s7 }
  0x1d   : > { %p643_p13 = scmp.lt.u32.totalorder %s634_s7, %s878_s30 }
  0x1e   : > { %p638_p6 = pneg %p637_p5  ;;  %p642_p10 = por %p641_p7, %p640_p4 }
  0x20   : > { %p644_p12 = por %p643_p13, %p642_p10 }
  0x22   : > { %p645_p1 = pnand %p644_p12, %p638_p6 }
  0x24   : > { %648 = shalt.err (!%p645_p1)
}
  0x25   : > { %s649_s20 = scalar_lea.vmem %s882_s4, 512  ;;  %s782_s28 = smov [#allocation2]  }
  0x26   : > { %p650_p2 = scmp.ne.s32.totalorder %s882_s4, %s649_s20  ;;  %s654_s29 = sshll.u32 %s782_s28, 4  ;;  %s655_s29 = int_to_ptr.vmem [resolvable:$false] %s654_s29 }
  0x27   : > { %s656_s3 = scalar_lea.vmem %s655_s29, 1024  ;;  %p657_p9 = scmp.lt.s32.totalorder %s882_s4, %s655_s29 }
  0x28   : > { %p652_p5 = pnand %p650_p2, %p636_p3  ;;  %p658_p4 = scmp.lt.s32.totalorder %s656_s3, %s649_s20 }
  0x2a   : > { %p653_p11 = pneg %p652_p5  ;;  %p659_p7 = por %p658_p4, %p657_p9 }
  0x2c   : > { %p660_p10 = pnand %p659_p7, %p653_p11 }
  0x2e   : > { %663 = shalt.err (!%p660_p10)
}
  0x2f   : > { %s783_s7 = smov 128   ;;  %s784_s8 = smov 8  }
  0x30   : > { %547 = dma.hbm_to_vmem [thread:$0]  (!%p886_p0), %s878_s30, 512, %s882_s4, %s147_s6, %s783_s7, %s783_s7, %s784_s8  }
  0x31   : > { %p192_p9 = scmp.lt.s32.totalorder %s780_s14, 3  ;;  %s928_s18 = scalar_lea.hbm %s1137_s1, %s535_s27 }
  0x32   : > { %p1146_p11 = scmp.ge.s32.totalorder %s780_s14, 1  ;;  %s174_s20 = scalar_lea.vmem [#allocation5], %s514_s26 }
  0x33   : > { %s184_s28 = sshll.u32 %s174_s20, 4  ;;  %s171_s30 = scalar_lea.sflag [#allocation6], %s869_s25  ;;  %s938_s28 = int_to_ptr.vmem [resolvable:$true] %s184_s28 }
  0x34   : > { %p932_p12 = pnand %p1146_p11, %p192_p9  ;;  %s664_s4 = scalar_lea.hbm %s928_s18, 512 }
  0x35   : > { %p665_p1 = scmp.ne.s32.totalorder %s928_s18, %s664_s4  ;;  %s669_s29 = scalar_lea.hbm %s1137_s1, 1024 }
  0x36   : > { %p670_p2 = scmp.lt.u32.totalorder %s928_s18, %s1137_s1  ;;  %p671_p5 = scmp.lt.u32.totalorder %s669_s29, %s664_s4 }
  0x37   : > { %p667_p6 = pnand %p665_p1, %p636_p3  ;;  %p673_p7 = scmp.lt.u32.totalorder %s664_s4, %s928_s18 }
  0x38   : > { %p672_p4 = por %p671_p5, %p670_p2 }
  0x39   : > { %p668_p13 = pneg %p667_p6 }
  0x3a   : > { %p674_p10 = por %p673_p7, %p672_p4 }
  0x3c   : > { %p675_p9 = pnand %p674_p10, %p668_p13 }
  0x3e   : > { %678 = shalt.err (!%p675_p9)
}
  0x3f   : > { %s679_s26 = scalar_lea.vmem %s938_s28, 512  ;;  %s785_s16 = smov [#allocation5]  }
  0x40   : > { %p680_p11 = scmp.ne.s32.totalorder %s938_s28, %s679_s26  ;;  %s684_s20 = sshll.u32 %s785_s16, 4  ;;  %s685_s20 = int_to_ptr.vmem [resolvable:$false] %s684_s20 }
  0x41   : > { %s686_s27 = scalar_lea.vmem %s685_s20, 1024  ;;  %p687_p8 = scmp.lt.s32.totalorder %s938_s28, %s685_s20 }
  0x42   : > { %p682_p1 = pnand %p680_p11, %p636_p3  ;;  %p688_p2 = scmp.lt.s32.totalorder %s686_s27, %s679_s26 }
  0x44   : > { %p683_p6 = pneg %p682_p1  ;;  %p689_p5 = por %p688_p2, %p687_p8 }
  0x46   : > { %p690_p4 = pnand %p689_p5, %p683_p6 }
  0x48   : > { %693 = shalt.err (!%p690_p4)
}
  0x49   : > { %550 = dma.hbm_to_vmem [thread:$0]  (!%p886_p0), %s928_s18, 512, %s938_s28, %s171_s30, %s783_s7, %s783_s7, %s784_s8  }
  0x4a   : > { %196 = sbr.rel (%p932_p12) target bundleno = 146 (0x92), region = 28  ;;  %s972_s4 = sand.u32 (!%p932_p12), 1, %s764_s10  }
  0x4b   : > { %s975_s6 = sshll.u32 (!%p932_p12), %s972_s4, 5  ;;  %s199_s5 = scalar_lea.sflag (!%p932_p12), [#allocation3], %s972_s4 }
  0x4c   : > { %s202_s29 = scalar_lea.vmem (!%p932_p12), [#allocation2], %s975_s6  ;;  %p1148_p8 = scmp.ne.s32.totalorder (!%p932_p12), %s1142_s21, 0 }
  0x51   : > { %747 = dma.done.wait (%p1148_p8), %s199_s5, 512  }
  0x52   : > { %749 = vsyncadd (%p1148_p8), %s199_s5, 4294966784  ;;  %s208_s25 = scalar_lea.sflag [#allocation6], %s972_s4  ;;  %s211_s7 = scalar_lea.vmem [#allocation5], %s975_s6 }
  0x53   : > { %751 = dma.done.wait (%p1148_p8), %s208_s25, 512  }
  0x54   : > { %753 = vsyncadd (%p1148_p8), %s208_s25, 4294966784  ;;  %v989_v0 = vld [vmem:[%s202_s29] sm:$0xff]  ;;  %v991_v1 = vld [vmem:[%s202_s29 + $0x8] sm:$0xff]  ;;  %s1014_s21 = scalar_lea.vmem [#allocation7], %s975_s6  ;;  %s537_s8 = sshll.u32 %s772_s12, 9 }
  0x55   : > { %v993_v2 = vld [vmem:[%s202_s29 + $0x10] sm:$0xff]  ;;  %v995_v3 = vld [vmem:[%s202_s29 + $0x18] sm:$0xff]  ;;  %v997_v4 = vld [vmem:[%s211_s7] sm:$0xff]  ;;  %v257_v6 = vand.u32 2147483647, %v989_v0  ;;  %vm273_vm0 = vcmp.ge.f32.partialorder %v989_v0, 0.0  ;;  %s1084_s30 = scalar_lea.hbm %s1138_s2, %s537_s8 }
  0x56   : > { %v999_v5 = vld [vmem:[%s211_s7 + $0x8] sm:$0xff]  ;;  %v258_v7 = vand.u32 2147483647, %v991_v1  ;;  %v259_v8 = vand.u32 2147483647, %v993_v2  ;;  %v1006_v10 = vld [vmem:[%s211_s7 + $0x10] sm:$0xff]  ;;  %v297_v31 = vmul.f32 %v997_v4, %v989_v0 }
  0x57   : > { %v364_v9 = vadd.f32 %v999_v5, %v997_v4  ;;  %v260_v11 = vand.u32 2147483647, %v995_v3  ;;  %v261_v12 = vsub.f32 0.0, %v257_v6  ;;  %v1010_v16 = vld [vmem:[%s211_s7 + $0x18] sm:$0xff]  ;;  %vm274_vm1 = vcmp.ge.f32.partialorder %v991_v1, 0.0  ;;  %s392_s18 = sshll.u32 %s1014_s21, 4  ;;  %s1086_s18 = int_to_ptr.vmem [resolvable:$true] %s392_s18 }
  0x58   : > { %v262_v13 = vsub.f32 0.0, %v258_v7  ;;  %v263_v14 = vsub.f32 0.0, %v259_v8  ;;  %vm275_vm2 = vcmp.ge.f32.partialorder %v993_v2, 0.0  ;;  %vm276_vm3 = vcmp.ge.f32.partialorder %v995_v3, 0.0  ;;  %s377_s3 = scalar_lea.sflag [#allocation4], %s972_s4  ;;  %s694_s15 = scalar_lea.vmem %s1086_s18, 512 }
  0x59   : > { %v365_v15 = vadd.f32 %v364_v9, %v1006_v10  ;;  %v264_v17 = vsub.f32 0.0, %v260_v11  ;;  %v265_v18 = vmul.f32 1.442695, %v261_v12  ;;  %v293_v33 = vmax.f32 %v989_v0, 0.0  ;;  %p695_p0 = scmp.ne.s32.totalorder %s1086_s18, %s694_s15  ;;  %p1155_p3 = scmp.ne.s32.totalorder %s1143_s22, 0 }
  0x5a   : > { %v267_v19 = vmul.f32 1.442695, %v262_v13  ;;  %v269_v20 = vmul.f32 1.442695, %v263_v14  ;;  %v294_v34 = vmax.f32 %v991_v1, 0.0  ;;  %v295_v36 = vmax.f32 %v993_v2, 0.0 }
  0x5b   : > { %v366_v21 = vadd.f32 %v365_v15, %v1010_v16  ;;  %610 = vpow2.f32 %v265_v18  ;;  %v271_v22 = vmul.f32 1.442695, %v264_v17  ;;  %v298_v37 = vmul.f32 %v999_v5, %v991_v1  ;;  %p696_p12 = pnand %p695_p0, %p1155_p3  ;;  %s786_s12 = smov [#allocation7]  }
  0x5c   : > { %612 = vpow2.f32 %v267_v19  ;;  %v299_v38 = vmul.f32 %v1006_v10, %v993_v2  ;;  %v296_v39 = vmax.f32 %v995_v3, 0.0  ;;  %v300_v47 = vmul.f32 %v1010_v16, %v995_v3  ;;  %s698_s26 = sshll.u32 %s786_s12, 4  ;;  %s699_s26 = int_to_ptr.vmem [resolvable:$false] %s698_s26 }
  0x5d   : > { %614 = vpow2.f32 %v269_v20  ;;  %527 = vst [vmem:[%s1014_s21 + $0x10] sm:$0xff] %v366_v21  ;;  %v301_v48 = vsub.f32 %v293_v33, %v297_v31  ;;  %v302_v52 = vsub.f32 %v294_v34, %v298_v37  ;;  %p697_p13 = pneg %p696_p12  ;;  %s700_s16 = scalar_lea.vmem %s699_s26, 1024 }
  0x5e   : > { %616 = vpow2.f32 %v271_v22  ;;  %v303_v53 = vsub.f32 %v295_v36, %v299_v38  ;;  %p701_p7 = scmp.lt.s32.totalorder %s1086_s18, %s699_s26  ;;  %p702_p10 = scmp.lt.s32.totalorder %s700_s16, %s694_s15 }
  0x60   : > { %p703_p9 = por %p702_p10, %p701_p7 }
  0x62   : > { %p704_p11 = pnand %p703_p9, %p697_p13 }
  0x65   : > { %v611_v23 = vpop.eup %610 }
  0x66   : > { %v613_v24 = vpop.eup %612  ;;  %v281_v25 = vadd.f32 1.0, %v611_v23  ;;  %v308_v32 = vmul.f32 -0.5, %v611_v23  ;;  %v277_v42 = vsel %vm273_vm0, 1.0, %v611_v23  ;;  %v311_v44 = vand.u32 2147483647, %v611_v23 }
  0x67   : > { %v1017_v26 = vpop.eup %614  ;;  %v282_v27 = vadd.f32 1.0, %v613_v24  ;;  %v317_v35 = vmul.f32 -0.5, %v613_v24  ;;  %v320_v45 = vand.u32 2147483647, %v613_v24  ;;  %v278_v46 = vsel %vm274_vm1, 1.0, %v613_v24 }
  0x68   : > { %v1019_v28 = vpop.eup %616  ;;  %v283_v29 = vadd.f32 1.0, %v1017_v26  ;;  %618 = vrcp.f32 %v281_v25  ;;  %v326_v40 = vmul.f32 -0.5, %v1017_v26  ;;  %v309_v43 = vadd.f32 1.0, %v308_v32 }
  0x69   : > { %v284_v30 = vadd.f32 1.0, %v1019_v28  ;;  %620 = vrcp.f32 %v282_v27  ;;  %v335_v41 = vmul.f32 -0.5, %v1019_v28  ;;  %v318_v49 = vadd.f32 1.0, %v317_v35 }
  0x6a   : > { %622 = vrcp.f32 %v283_v29  ;;  %v279_v51 = vsel %vm275_vm2, 1.0, %v1017_v26  ;;  %v329_v54 = vand.u32 2147483647, %v1017_v26  ;;  %v280_v56 = vsel %vm276_vm3, 1.0, %v1019_v28 }
  0x6b   : > { %624 = vrcp.f32 %v284_v30  ;;  %v327_v58 = vadd.f32 1.0, %v326_v40  ;;  %v336_v59 = vadd.f32 1.0, %v335_v41  ;;  %v310_v62 = vmul.f32 %v611_v23, %v309_v43 }
  0x6c   : > { %626 = vlog2.f32 %v281_v25  ;;  %vm1052_vm4 = vcmp.lt.f32.partialorder %v311_v44, 0.0004427343  ;;  %vm1056_vm5 = vcmp.lt.f32.partialorder %v320_v45, 0.0004427343  ;;  %v319_v3 = vmul.f32 %v613_v24, %v318_v49 }
  0x6d   : > { %628 = vlog2.f32 %v282_v27  ;;  %v338_v7 = vand.u32 2147483647, %v1019_v28  ;;  %vm1063_vm6 = vcmp.lt.f32.partialorder %v329_v54, 0.0004427343  ;;  %v328_v18 = vmul.f32 %v1017_v26, %v327_v58 }
  0x6e   : > { %630 = vlog2.f32 %v283_v29  ;;  %v304_v24 = vsub.f32 %v296_v39, %v300_v47 }
  0x6f   : > { %632 = vlog2.f32 %v284_v30  ;;  %vm339_vm7 = vcmp.lt.f32.partialorder %v338_v7, 0.0004427343 }
  0x72   : > { %v619_v50 = vpop.eup %618 }
  0x73   : > { %v621_v55 = vpop.eup %620  ;;  %v286_v57 = vmul.f32 %v619_v50, %v277_v42 }
  0x74   : > { %v623_v60 = vpop.eup %622  ;;  %v288_v61 = vmul.f32 %v621_v55, %v278_v46 }
  0x75   : > { %v625_v1 = vpop.eup %624  ;;  %v290_v2 = vmul.f32 %v623_v60, %v279_v51  ;;  %v346_v6 = vmul.f32 %v286_v57, %v997_v4  ;;  %v337_v4 = vmul.f32 %v1019_v28, %v336_v59 }
  0x76   : > { %v627_v8 = vpop.eup %626  ;;  %v292_v9 = vmul.f32 %v625_v1, %v280_v56  ;;  %v347_v11 = vmul.f32 %v288_v61, %v999_v5  ;;  %v357_v12 = vadd.f32 %v288_v61, %v286_v57 }
  0x77   : > { %v629_v14 = vpop.eup %628  ;;  %v348_v15 = vmul.f32 %v290_v2, %v1006_v10  ;;  %v307_v17 = vmul.f32 0.6931472, %v627_v8 }
  0x78   : > { %v631_v19 = vpop.eup %630  ;;  %v349_v20 = vmul.f32 %v292_v9, %v1010_v16  ;;  %v350_v21 = vadd.f32 %v347_v11, %v346_v6  ;;  %v358_v22 = vadd.f32 %v357_v12, %v290_v2  ;;  %v316_v23 = vmul.f32 0.6931472, %v629_v14 }
  0x79   : > { %v633_v5 = vpop.eup %632  ;;  %v313_v25 = vsel %vm1052_vm4, %v310_v62, %v307_v17  ;;  %v325_v27 = vmul.f32 0.6931472, %v631_v19 }
  0x7a   : > { %v351_v10 = vadd.f32 %v350_v21, %v348_v15  ;;  %v359_v26 = vadd.f32 %v358_v22, %v292_v9  ;;  %v322_v28 = vsel %vm1056_vm5, %v319_v3, %v316_v23  ;;  %v334_v16 = vmul.f32 0.6931472, %v633_v5 }
  0x7b   : > { %v331_v29 = vsel %vm1063_vm6, %v328_v18, %v325_v27  ;;  %v341_v30 = vadd.f32 %v313_v25, %v301_v48  ;;  %v342_v31 = vadd.f32 %v322_v28, %v302_v52 }
  0x7c   : > { %v352_v32 = vadd.f32 %v351_v10, %v349_v20  ;;  %v340_v33 = vsel %vm339_vm7, %v337_v4, %v334_v16  ;;  %v343_v34 = vadd.f32 %v331_v29, %v303_v53  ;;  %525 = vst [vmem:[%s1014_s21 + $0x8] sm:$0xff] %v359_v26 }
  0x7d   : > { %v344_v35 = vadd.f32 %v340_v33, %v304_v24  ;;  %v371_v36 = vadd.f32 %v342_v31, %v341_v30 }
  0x7e   : > { %354 = vst [vmem:[%s1014_s21] sm:$0xff] %v352_v32 }
  0x7f   : > { %v372_v37 = vadd.f32 %v371_v36, %v343_v34 }
  0x81   : > { %v373_v38 = vadd.f32 %v372_v37, %v344_v35 }
  0x83   : > { %529 = vst [vmem:[%s1014_s21 + $0x18] sm:$0xff] %v373_v38 }
  0x84   : > { %707 = shalt.err (!%p704_p11)
}
  0x85   : > { %s708_s20 = scalar_lea.hbm %s1084_s30, 512  ;;  %s712_s5 = scalar_lea.hbm %s1138_s2, 1024 }
  0x86   : > { %p709_p1 = scmp.ne.s32.totalorder %s1084_s30, %s708_s20  ;;  %p713_p5 = scmp.lt.u32.totalorder %s1084_s30, %s1138_s2 }
  0x87   : > { %p714_p4 = scmp.lt.u32.totalorder %s712_s5, %s708_s20  ;;  %p716_p0 = scmp.lt.u32.totalorder %s708_s20, %s1084_s30 }
  0x88   : > { %p710_p6 = pnand %p709_p1, %p1155_p3 }
  0x89   : > { %p715_p8 = por %p714_p4, %p713_p5 }
  0x8a   : > { %p711_p2 = pneg %p710_p6 }
  0x8b   : > { %p717_p12 = por %p716_p0, %p715_p8 }
  0x8d   : > { %p718_p13 = pnand %p717_p12, %p711_p2 }
  0x8f   : > { %721 = shalt.err (!%p718_p13)
}
  0x90   : > { %s787_s7 = smov 128   ;;  %s788_s21 = smov 8  }
  0x91   : > { %542 = dma.vmem_to_hbm [thread:$0]  (%p1155_p3), %s1086_s18, 512, %s1084_s30, %s377_s3, %s787_s7, %s787_s7, %s788_s21  }
  0x92 PF: > { %s407_s8 = sand.u32 1, %s760_s9   ;;  %p1156_p7 = scmp.ne.s32.totalorder %s1144_s24, 0 }
  0x93   : > { %p1157_p10 = scmp.ge.s32.totalorder %s780_s14, 2  ;;  %s408_s19 = scalar_lea.sflag [#allocation4], %s407_s8 }
  0x95   : > { %p552_p9 = pnand %p1157_p10, %p1156_p7 }
  0x97   : > { %755 = dma.done.wait (!%p552_p9), %s408_s19, 512  }
  0x98   : > { %757 = vsyncadd (!%p552_p9), %s408_s19, 4294966784  ;;  %s21_s14 = sadd.s32 1, %s780_s14   ;;  %s1158_s9 = smov %s764_s10 }
  0x99   : > { %p18_p11 = scmp.ge.s32.totalorder %s21_s14, 4   ;;  %s1159_s10 = smov %s768_s11 }
  0x9a   : > { %s1160_s11 = smov %s860_s23  ;;  %s1161_s12 = smov %s776_s13 }
  0x9b   : > { %s1162_s13 = smov %s1164_s17  ;;  %20 = sbr.rel (!%p18_p11) target bundleno = 8 (0x8), region = 93 }
  0xa2   :  { %413 = vsyncpa [#allocation3], 1 }
  0xa3   :  { %415 = vsyncpa [#allocation3 + $0x1], 1 }
  0xa4   :  { %416 = vsyncpa [#allocation6], 1 }
  0xa5   :  { %418 = vsyncpa [#allocation6 + $0x1], 1 }
  0xa6   :  { %419 = vsyncpa [#allocation4], 1 }
  0xa7   :  { %421 = vsyncpa [#allocation4 + $0x1], 1 }

</bundles_post_ra>
